<compile_context>
chip_gen: v7x
topology: tpu7x:2x2x1
jax: 0.10.0
libtpu: 0.0.40
codegen_flags: <defaults>
</compile_context>

<pallas_src>
import functools
import math

import jax
import jax.numpy as jnp
from jax.experimental import pallas as pl
from jax.experimental.pallas import tpu as pltpu


def _round_up(x, m):
    return (x + m - 1) // m * m


def _crosshatch_kernel(row_ref, col_ref, out_ref, stats_ref, *,
                       tile_rows, w_pad, height, pair_params, rand_scale):
    """One (tile_rows, w_pad) row tile of the accumulated fractal noise.

    row_ref   : (1, w_pad)         f32  sum_o p^o * sin(x_w * scale_o)
    col_ref   : (tile_rows, 1)     f32  sum_o p^o * sin(y_h * scale_o)
    out_ref   : (tile_rows, w_pad) f32  un-normalized noise
    stats_ref : (1, 2, w_pad)      f32  per-column [min; max] over the VALID
                                        rows of this tile (padded rows masked).
    """
    t = pl.program_id(0)

    # Deterministic separable part (broadcast row + column vectors).
    acc = row_ref[...] + col_ref[...]                       # (tile_rows, w_pad)

    # Absolute pixel id -> stateless hash PRNG (tiling-independent).
    row_l = jax.lax.broadcasted_iota(jnp.int32, (tile_rows, w_pad), 0)
    col_l = jax.lax.broadcasted_iota(jnp.int32, (tile_rows, w_pad), 1)
    row_g = row_l + t * tile_rows
    pid = (row_g * w_pad + col_l).astype(jnp.uint32)

    c1 = jnp.uint32(0x85EBCA6B)
    c2 = jnp.uint32(0xC2B2AE35)
    mask16 = jnp.uint32(0xFFFF)
    scale16 = jnp.float32(rand_scale)                       # (frequency+1) / 2**16

    # One 32-bit hash per PAIR of octaves; the low / high 16-bit halves give
    # two independent uniform ints in [0, frequency] (only ~9 bits needed).
    for key, w_lo, w_hi in pair_params:
        h = (pid ^ jnp.uint32(key)) * c1
        h = h ^ (h >> 15)
        h = h * c2
        h = h ^ (h >> 13)
        lo = (h & mask16).astype(jnp.int32).astype(jnp.float32)
        acc = acc + jnp.float32(w_lo) * jnp.floor(lo * scale16)
        if w_hi is not None:
            hi = (h >> 16).astype(jnp.int32).astype(jnp.float32)
            acc = acc + jnp.float32(w_hi) * jnp.floor(hi * scale16)

    out_ref[...] = acc                                      # single lane-dense store

    # Per-column min/max over valid rows (padded rows masked with +/-big);
    # padded columns are cropped in the epilogue.
    valid = row_g < height
    big = jnp.float32(3.0e38)
    mns = jnp.min(jnp.where(valid, acc, big), axis=0, keepdims=True)
    mxs = jnp.max(jnp.where(valid, acc, -big), axis=0, keepdims=True)
    stats_ref[...] = jnp.concatenate([mns, mxs], axis=0).reshape(1, 2, w_pad)


def cross_hatch_linear_power_fractal(batch_size, width, height, *,
                                     frequency=320, octaves=12, persistence=1.5,
                                     angle_degrees=45, gain=0.1,
                                     add_noise_tolerance=0.25, mapping_range=24,
                                     brightness=0.0, contrast=0.0, seed=0):
    # brightness / contrast / angle_degrees are stored but unused by the torch
    # forward; kept only for signature fidelity.
    del angle_degrees, brightness, contrast
    H, W = int(height), int(width)
    steps = int(min(max(mapping_range, 4), 256))

    # Lane/sublane-aligned padded compute shape (cropped afterwards).
    W_pad = _round_up(max(W, 1), 128)
    H8 = _round_up(max(H, 1), 8)
    target_tile_bytes = 1 << 20                             # ~1 MiB output tile
    th_cap = max(8, (target_tile_bytes // (W_pad * 4)) // 8 * 8)
    TH = min(H8, th_cap)
    if H8 >= 16 and TH >= H8:
        # Guarantee >= 2 grid steps so the "parallel" axis actually splits
        # across v7x's two TensorCores (no effect on v5e/v6e, single TC).
        TH = max(8, (H8 // 2) // 8 * 8)
    H_pad = _round_up(H8, TH)
    n_tiles = H_pad // TH

    # Separable deterministic terms, pre-summed over octaves (tiny XLA work:
    # octaves*(H+W) sins instead of 2*octaves*H*W in-kernel).
    octs = jnp.arange(octaves, dtype=jnp.float32)
    scales = (jnp.float32(frequency) * (2.0 ** octs) * jnp.float32(gain)
              * jnp.float32(math.pi))                       # (octaves,)
    amps = jnp.float32(persistence) ** octs                 # (octaves,)
    xw = jnp.arange(W_pad, dtype=jnp.float32) / jnp.float32(max(W - 1, 1))
    yh = jnp.arange(H_pad, dtype=jnp.float32) / jnp.float32(max(H - 1, 1))
    row = jnp.sum(amps[:, None] * jnp.sin(xw[None, :] * scales[:, None]),
                  axis=0).reshape(1, W_pad)                 # (1, W_pad)
    col = jnp.sum(amps[:, None] * jnp.sin(yh[None, :] * scales[:, None]),
                  axis=0).reshape(H_pad, 1)                 # (H_pad, 1)

    # Static per-octave weights (persistence**o * tol), grouped in pairs that
    # share one 32-bit hash (low / high 16-bit halves).
    tol = float(add_noise_tolerance)
    oct_w = [float(persistence) ** o * tol for o in range(octaves)]
    pair_params = []
    for p_i, o in enumerate(range(0, octaves, 2)):
        key = (int(seed) * 0x9E3779B9 + (p_i + 1) * 0x61C88647
               + 0x0B5297A5) & 0xFFFFFFFF
        w_lo = oct_w[o]
        w_hi = oct_w[o + 1] if o + 1 < octaves else None
        pair_params.append((key, w_lo, w_hi))
    pair_params = tuple(pair_params)

    kernel = functools.partial(
        _crosshatch_kernel,
        tile_rows=TH, w_pad=W_pad, height=H,
        pair_params=pair_params,
        rand_scale=float(int(frequency) + 1) / 65536.0)     # randint high is exclusive

    noise, stats = pl.pallas_call(
        kernel,
        out_shape=(jax.ShapeDtypeStruct((H_pad, W_pad), jnp.float32),
                   jax.ShapeDtypeStruct((n_tiles, 2, W_pad), jnp.float32)),
        grid_spec=pltpu.PrefetchScalarGridSpec(
            num_scalar_prefetch=0,
            grid=(n_tiles,),
            in_specs=[pl.BlockSpec((1, W_pad), lambda t: (0, 0)),
                      pl.BlockSpec((TH, 1), lambda t: (t, 0))],
            out_specs=[pl.BlockSpec((TH, W_pad), lambda t: (t, 0)),
                       pl.BlockSpec((1, 2, W_pad), lambda t: (t, 0, 0))],
        ),
        compiler_params=pltpu.CompilerParams(
            dimension_semantics=("parallel",),
            vmem_limit_bytes=32 * 1024 * 1024),
    )(row, col)

    # Global epilogue: min/max is global -> reduce the tiny per-tile stats,
    # then normalize + quantize (guard max == min).
    img = noise[:H, :W]
    mn = jnp.min(stats[:, 0, :W])
    mx = jnp.max(stats[:, 1, :W])
    denom = mx - mn
    inv = jnp.where(denom != 0, 1.0 / denom, 0.0)
    n01 = (img - mn) * inv                                   # normalize(noise, 0, 1)
    q = jnp.clip(jnp.round(n01 * (steps - 1)), 0.0, float(steps - 1))
    img = q * jnp.float32(1.0 / (steps - 1))                 # step_mapping lookup

    # Every batch element is identical in torch (RNG reseeded per octave from
    # `seed`, independent of the batch index) -> compute once, broadcast.
    return jnp.broadcast_to(img[None, :, :, None], (int(batch_size), H, W, 3))


if __name__ == "__main__":
    # The module has no tensor inputs; derive the integer seed deterministically
    # from jax.random.PRNGKey(0).
    seed = int(jax.random.randint(jax.random.PRNGKey(0), (), 0, 2 ** 16))
    batch, height, width = 2, 64, 128
    out = cross_hatch_linear_power_fractal(
        batch, width, height,
        frequency=320, octaves=12, persistence=1.5, gain=0.1,
        add_noise_tolerance=0.25, mapping_range=24, seed=seed)
    out = jax.block_until_ready(out)
    assert out.shape == (batch, height, width, 3), out.shape
    assert out.dtype == jnp.float32, out.dtype
    assert bool(jnp.all(jnp.isfinite(out)))
    assert bool(jnp.all((out >= 0.0) & (out <= 1.0)))
    assert bool(jnp.all(out[0] == out[1]))   # batch elements identical, as in torch
    print("KERNEL_OK")
</pallas_src>

<mosaic_0001>
module attributes {stable_mosaic.version = 11 : i64} {
  func.func @_crosshatch_kernel(%arg0: i32, %arg1: memref<1x128xf32, #tpu.memory_space<vmem>>, %arg2: memref<32x1xf32, #tpu.memory_space<vmem>>, %arg3: memref<32x128xf32, #tpu.memory_space<vmem>>, %arg4: memref<1x2x128xf32, #tpu.memory_space<vmem>>) attributes {dimension_semantics = [#tpu.dimension_semantics<parallel>], iteration_bounds = array<i64: 2>, scalar_prefetch = 0 : i64, scratch_operands = 0 : i64, tpu.core_type = #tpu.core_type<tc>, window_params = [{pipeline_mode = #tpu.pipeline_mode<synchronous>, transform_indices = @transform_0, window_bounds = array<i64: 1, 128>}, {transform_indices = @transform_1, window_bounds = array<i64: 32, 1>}, {transform_indices = @transform_2, window_bounds = array<i64: 32, 128>}, {transform_indices = @transform_3, window_bounds = array<i64: 1, 2, 128>}]} {
    %c0 = arith.constant 0 : index
    %c0_0 = arith.constant 0 : index
    %0 = vector.load %arg1[%c0, %c0_0] : memref<1x128xf32, #tpu.memory_space<vmem>>, vector<1x128xf32>
    %c0_1 = arith.constant 0 : index
    %c0_2 = arith.constant 0 : index
    %1 = vector.load %arg2[%c0_1, %c0_2] : memref<32x1xf32, #tpu.memory_space<vmem>>, vector<32x1xf32>
    %2 = vector.broadcast %0 : vector<1x128xf32> to vector<32x128xf32>
    %3 = vector.broadcast %1 : vector<32x1xf32> to vector<32x128xf32>
    %4 = arith.addf %2, %3 : vector<32x128xf32>
    %5 = tpu.iota {dimensions = array<i32: 0>} : vector<32x128xi32>
    %6 = tpu.iota {dimensions = array<i32: 1>} : vector<32x128xi32>
    %c32_i32 = arith.constant 32 : i32
    %7 = arith.muli %arg0, %c32_i32 : i32
    %8 = vector.broadcast %7 : i32 to vector<32x128xi32>
    %9 = arith.addi %5, %8 : vector<32x128xi32>
    %c128_i32 = arith.constant 128 : i32
    %10 = vector.broadcast %c128_i32 : i32 to vector<32x128xi32>
    %11 = arith.muli %9, %10 : vector<32x128xi32>
    %12 = arith.addi %11, %6 : vector<32x128xi32>
    %c2137738985_i32 = arith.constant 2137738985 : i32
    %13 = vector.broadcast %c2137738985_i32 : i32 to vector<32x128xi32>
    %14 = arith.xori %12, %13 : vector<32x128xi32>
    %c-2048144789_i32 = arith.constant -2048144789 : i32
    %15 = vector.broadcast %c-2048144789_i32 : i32 to vector<32x128xi32>
    %16 = arith.muli %14, %15 : vector<32x128xi32>
    %c15_i32 = arith.constant 15 : i32
    %17 = vector.broadcast %c15_i32 : i32 to vector<32x128xi32>
    %18 = arith.shrui %16, %17 : vector<32x128xi32>
    %19 = arith.xori %16, %18 : vector<32x128xi32>
    %c-1028477387_i32 = arith.constant -1028477387 : i32
    %20 = vector.broadcast %c-1028477387_i32 : i32 to vector<32x128xi32>
    %21 = arith.muli %19, %20 : vector<32x128xi32>
    %c13_i32 = arith.constant 13 : i32
    %22 = vector.broadcast %c13_i32 : i32 to vector<32x128xi32>
    %23 = arith.shrui %21, %22 : vector<32x128xi32>
    %24 = arith.xori %21, %23 : vector<32x128xi32>
    %c65535_i32 = arith.constant 65535 : i32
    %25 = vector.broadcast %c65535_i32 : i32 to vector<32x128xi32>
    %26 = arith.andi %24, %25 : vector<32x128xi32>
    %27 = arith.sitofp %26 : vector<32x128xi32> to vector<32x128xf32>
    %cst = arith.constant 0.00489807129 : f32
    %28 = vector.broadcast %cst : f32 to vector<32x128xf32>
    %29 = arith.mulf %27, %28 : vector<32x128xf32>
    %30 = math.floor %29 : vector<32x128xf32>
    %cst_3 = arith.constant 2.500000e-01 : f32
    %31 = vector.broadcast %cst_3 : f32 to vector<32x128xf32>
    %32 = arith.mulf %31, %30 : vector<32x128xf32>
    %33 = arith.addf %4, %32 : vector<32x128xf32>
    %c16_i32 = arith.constant 16 : i32
    %34 = vector.broadcast %c16_i32 : i32 to vector<32x128xi32>
    %35 = arith.shrui %24, %34 : vector<32x128xi32>
    %36 = arith.sitofp %35 : vector<32x128xi32> to vector<32x128xf32>
    %cst_4 = arith.constant 0.00489807129 : f32
    %37 = vector.broadcast %cst_4 : f32 to vector<32x128xf32>
    %38 = arith.mulf %36, %37 : vector<32x128xf32>
    %39 = math.floor %38 : vector<32x128xf32>
    %cst_5 = arith.constant 3.750000e-01 : f32
    %40 = vector.broadcast %cst_5 : f32 to vector<32x128xf32>
    %41 = arith.mulf %40, %39 : vector<32x128xf32>
    %42 = arith.addf %33, %41 : vector<32x128xf32>
    %c-516696784_i32 = arith.constant -516696784 : i32
    %43 = vector.broadcast %c-516696784_i32 : i32 to vector<32x128xi32>
    %44 = arith.xori %12, %43 : vector<32x128xi32>
    %c-2048144789_i32_6 = arith.constant -2048144789 : i32
    %45 = vector.broadcast %c-2048144789_i32_6 : i32 to vector<32x128xi32>
    %46 = arith.muli %44, %45 : vector<32x128xi32>
    %c15_i32_7 = arith.constant 15 : i32
    %47 = vector.broadcast %c15_i32_7 : i32 to vector<32x128xi32>
    %48 = arith.shrui %46, %47 : vector<32x128xi32>
    %49 = arith.xori %46, %48 : vector<32x128xi32>
    %c-1028477387_i32_8 = arith.constant -1028477387 : i32
    %50 = vector.broadcast %c-1028477387_i32_8 : i32 to vector<32x128xi32>
    %51 = arith.muli %49, %50 : vector<32x128xi32>
    %c13_i32_9 = arith.constant 13 : i32
    %52 = vector.broadcast %c13_i32_9 : i32 to vector<32x128xi32>
    %53 = arith.shrui %51, %52 : vector<32x128xi32>
    %54 = arith.xori %51, %53 : vector<32x128xi32>
    %c65535_i32_10 = arith.constant 65535 : i32
    %55 = vector.broadcast %c65535_i32_10 : i32 to vector<32x128xi32>
    %56 = arith.andi %54, %55 : vector<32x128xi32>
    %57 = arith.sitofp %56 : vector<32x128xi32> to vector<32x128xf32>
    %cst_11 = arith.constant 0.00489807129 : f32
    %58 = vector.broadcast %cst_11 : f32 to vector<32x128xf32>
    %59 = arith.mulf %57, %58 : vector<32x128xf32>
    %60 = math.floor %59 : vector<32x128xf32>
    %cst_12 = arith.constant 5.625000e-01 : f32
    %61 = vector.broadcast %cst_12 : f32 to vector<32x128xf32>
    %62 = arith.mulf %61, %60 : vector<32x128xf32>
    %63 = arith.addf %42, %62 : vector<32x128xf32>
    %c16_i32_13 = arith.constant 16 : i32
    %64 = vector.broadcast %c16_i32_13 : i32 to vector<32x128xi32>
    %65 = arith.shrui %54, %64 : vector<32x128xi32>
    %66 = arith.sitofp %65 : vector<32x128xi32> to vector<32x128xf32>
    %cst_14 = arith.constant 0.00489807129 : f32
    %67 = vector.broadcast %cst_14 : f32 to vector<32x128xf32>
    %68 = arith.mulf %66, %67 : vector<32x128xf32>
    %69 = math.floor %68 : vector<32x128xf32>
    %cst_15 = arith.constant 8.437500e-01 : f32
    %70 = vector.broadcast %cst_15 : f32 to vector<32x128xf32>
    %71 = arith.mulf %70, %69 : vector<32x128xf32>
    %72 = arith.addf %63, %71 : vector<32x128xf32>
    %c1123834743_i32 = arith.constant 1123834743 : i32
    %73 = vector.broadcast %c1123834743_i32 : i32 to vector<32x128xi32>
    %74 = arith.xori %12, %73 : vector<32x128xi32>
    %c-2048144789_i32_16 = arith.constant -2048144789 : i32
    %75 = vector.broadcast %c-2048144789_i32_16 : i32 to vector<32x128xi32>
    %76 = arith.muli %74, %75 : vector<32x128xi32>
    %c15_i32_17 = arith.constant 15 : i32
    %77 = vector.broadcast %c15_i32_17 : i32 to vector<32x128xi32>
    %78 = arith.shrui %76, %77 : vector<32x128xi32>
    %79 = arith.xori %76, %78 : vector<32x128xi32>
    %c-1028477387_i32_18 = arith.constant -1028477387 : i32
    %80 = vector.broadcast %c-1028477387_i32_18 : i32 to vector<32x128xi32>
    %81 = arith.muli %79, %80 : vector<32x128xi32>
    %c13_i32_19 = arith.constant 13 : i32
    %82 = vector.broadcast %c13_i32_19 : i32 to vector<32x128xi32>
    %83 = arith.shrui %81, %82 : vector<32x128xi32>
    %84 = arith.xori %81, %83 : vector<32x128xi32>
    %c65535_i32_20 = arith.constant 65535 : i32
    %85 = vector.broadcast %c65535_i32_20 : i32 to vector<32x128xi32>
    %86 = arith.andi %84, %85 : vector<32x128xi32>
    %87 = arith.sitofp %86 : vector<32x128xi32> to vector<32x128xf32>
    %cst_21 = arith.constant 0.00489807129 : f32
    %88 = vector.broadcast %cst_21 : f32 to vector<32x128xf32>
    %89 = arith.mulf %87, %88 : vector<32x128xf32>
    %90 = math.floor %89 : vector<32x128xf32>
    %cst_22 = arith.constant 1.265625 : f32
    %91 = vector.broadcast %cst_22 : f32 to vector<32x128xf32>
    %92 = arith.mulf %91, %90 : vector<32x128xf32>
    %93 = arith.addf %72, %92 : vector<32x128xf32>
    %c16_i32_23 = arith.constant 16 : i32
    %94 = vector.broadcast %c16_i32_23 : i32 to vector<32x128xi32>
    %95 = arith.shrui %84, %94 : vector<32x128xi32>
    %96 = arith.sitofp %95 : vector<32x128xi32> to vector<32x128xf32>
    %cst_24 = arith.constant 0.00489807129 : f32
    %97 = vector.broadcast %cst_24 : f32 to vector<32x128xf32>
    %98 = arith.mulf %96, %97 : vector<32x128xf32>
    %99 = math.floor %98 : vector<32x128xf32>
    %cst_25 = arith.constant 1.8984375 : f32
    %100 = vector.broadcast %cst_25 : f32 to vector<32x128xf32>
    %101 = arith.mulf %100, %99 : vector<32x128xf32>
    %102 = arith.addf %93, %101 : vector<32x128xf32>
    %c-1530601026_i32 = arith.constant -1530601026 : i32
    %103 = vector.broadcast %c-1530601026_i32 : i32 to vector<32x128xi32>
    %104 = arith.xori %12, %103 : vector<32x128xi32>
    %c-2048144789_i32_26 = arith.constant -2048144789 : i32
    %105 = vector.broadcast %c-2048144789_i32_26 : i32 to vector<32x128xi32>
    %106 = arith.muli %104, %105 : vector<32x128xi32>
    %c15_i32_27 = arith.constant 15 : i32
    %107 = vector.broadcast %c15_i32_27 : i32 to vector<32x128xi32>
    %108 = arith.shrui %106, %107 : vector<32x128xi32>
    %109 = arith.xori %106, %108 : vector<32x128xi32>
    %c-1028477387_i32_28 = arith.constant -1028477387 : i32
    %110 = vector.broadcast %c-1028477387_i32_28 : i32 to vector<32x128xi32>
    %111 = arith.muli %109, %110 : vector<32x128xi32>
    %c13_i32_29 = arith.constant 13 : i32
    %112 = vector.broadcast %c13_i32_29 : i32 to vector<32x128xi32>
    %113 = arith.shrui %111, %112 : vector<32x128xi32>
    %114 = arith.xori %111, %113 : vector<32x128xi32>
    %c65535_i32_30 = arith.constant 65535 : i32
    %115 = vector.broadcast %c65535_i32_30 : i32 to vector<32x128xi32>
    %116 = arith.andi %114, %115 : vector<32x128xi32>
    %117 = arith.sitofp %116 : vector<32x128xi32> to vector<32x128xf32>
    %cst_31 = arith.constant 0.00489807129 : f32
    %118 = vector.broadcast %cst_31 : f32 to vector<32x128xf32>
    %119 = arith.mulf %117, %118 : vector<32x128xf32>
    %120 = math.floor %119 : vector<32x128xf32>
    %cst_32 = arith.constant 2.84765625 : f32
    %121 = vector.broadcast %cst_32 : f32 to vector<32x128xf32>
    %122 = arith.mulf %121, %120 : vector<32x128xf32>
    %123 = arith.addf %102, %122 : vector<32x128xf32>
    %c16_i32_33 = arith.constant 16 : i32
    %124 = vector.broadcast %c16_i32_33 : i32 to vector<32x128xi32>
    %125 = arith.shrui %114, %124 : vector<32x128xi32>
    %126 = arith.sitofp %125 : vector<32x128xi32> to vector<32x128xf32>
    %cst_34 = arith.constant 0.00489807129 : f32
    %127 = vector.broadcast %cst_34 : f32 to vector<32x128xf32>
    %128 = arith.mulf %126, %127 : vector<32x128xf32>
    %129 = math.floor %128 : vector<32x128xf32>
    %cst_35 = arith.constant 4.27148438 : f32
    %130 = vector.broadcast %cst_35 : f32 to vector<32x128xf32>
    %131 = arith.mulf %130, %129 : vector<32x128xf32>
    %132 = arith.addf %123, %131 : vector<32x128xf32>
    %c109930501_i32 = arith.constant 109930501 : i32
    %133 = vector.broadcast %c109930501_i32 : i32 to vector<32x128xi32>
    %134 = arith.xori %12, %133 : vector<32x128xi32>
    %c-2048144789_i32_36 = arith.constant -2048144789 : i32
    %135 = vector.broadcast %c-2048144789_i32_36 : i32 to vector<32x128xi32>
    %136 = arith.muli %134, %135 : vector<32x128xi32>
    %c15_i32_37 = arith.constant 15 : i32
    %137 = vector.broadcast %c15_i32_37 : i32 to vector<32x128xi32>
    %138 = arith.shrui %136, %137 : vector<32x128xi32>
    %139 = arith.xori %136, %138 : vector<32x128xi32>
    %c-1028477387_i32_38 = arith.constant -1028477387 : i32
    %140 = vector.broadcast %c-1028477387_i32_38 : i32 to vector<32x128xi32>
    %141 = arith.muli %139, %140 : vector<32x128xi32>
    %c13_i32_39 = arith.constant 13 : i32
    %142 = vector.broadcast %c13_i32_39 : i32 to vector<32x128xi32>
    %143 = arith.shrui %141, %142 : vector<32x128xi32>
    %144 = arith.xori %141, %143 : vector<32x128xi32>
    %c65535_i32_40 = arith.constant 65535 : i32
    %145 = vector.broadcast %c65535_i32_40 : i32 to vector<32x128xi32>
    %146 = arith.andi %144, %145 : vector<32x128xi32>
    %147 = arith.sitofp %146 : vector<32x128xi32> to vector<32x128xf32>
    %cst_41 = arith.constant 0.00489807129 : f32
    %148 = vector.broadcast %cst_41 : f32 to vector<32x128xf32>
    %149 = arith.mulf %147, %148 : vector<32x128xf32>
    %150 = math.floor %149 : vector<32x128xf32>
    %cst_42 = arith.constant 6.40722656 : f32
    %151 = vector.broadcast %cst_42 : f32 to vector<32x128xf32>
    %152 = arith.mulf %151, %150 : vector<32x128xf32>
    %153 = arith.addf %132, %152 : vector<32x128xf32>
    %c16_i32_43 = arith.constant 16 : i32
    %154 = vector.broadcast %c16_i32_43 : i32 to vector<32x128xi32>
    %155 = arith.shrui %144, %154 : vector<32x128xi32>
    %156 = arith.sitofp %155 : vector<32x128xi32> to vector<32x128xf32>
    %cst_44 = arith.constant 0.00489807129 : f32
    %157 = vector.broadcast %cst_44 : f32 to vector<32x128xf32>
    %158 = arith.mulf %156, %157 : vector<32x128xf32>
    %159 = math.floor %158 : vector<32x128xf32>
    %cst_45 = arith.constant 9.61083984 : f32
    %160 = vector.broadcast %cst_45 : f32 to vector<32x128xf32>
    %161 = arith.mulf %160, %159 : vector<32x128xf32>
    %162 = arith.addf %153, %161 : vector<32x128xf32>
    %c1750462028_i32 = arith.constant 1750462028 : i32
    %163 = vector.broadcast %c1750462028_i32 : i32 to vector<32x128xi32>
    %164 = arith.xori %12, %163 : vector<32x128xi32>
    %c-2048144789_i32_46 = arith.constant -2048144789 : i32
    %165 = vector.broadcast %c-2048144789_i32_46 : i32 to vector<32x128xi32>
    %166 = arith.muli %164, %165 : vector<32x128xi32>
    %c15_i32_47 = arith.constant 15 : i32
    %167 = vector.broadcast %c15_i32_47 : i32 to vector<32x128xi32>
    %168 = arith.shrui %166, %167 : vector<32x128xi32>
    %169 = arith.xori %166, %168 : vector<32x128xi32>
    %c-1028477387_i32_48 = arith.constant -1028477387 : i32
    %170 = vector.broadcast %c-1028477387_i32_48 : i32 to vector<32x128xi32>
    %171 = arith.muli %169, %170 : vector<32x128xi32>
    %c13_i32_49 = arith.constant 13 : i32
    %172 = vector.broadcast %c13_i32_49 : i32 to vector<32x128xi32>
    %173 = arith.shrui %171, %172 : vector<32x128xi32>
    %174 = arith.xori %171, %173 : vector<32x128xi32>
    %c65535_i32_50 = arith.constant 65535 : i32
    %175 = vector.broadcast %c65535_i32_50 : i32 to vector<32x128xi32>
    %176 = arith.andi %174, %175 : vector<32x128xi32>
    %177 = arith.sitofp %176 : vector<32x128xi32> to vector<32x128xf32>
    %cst_51 = arith.constant 0.00489807129 : f32
    %178 = vector.broadcast %cst_51 : f32 to vector<32x128xf32>
    %179 = arith.mulf %177, %178 : vector<32x128xf32>
    %180 = math.floor %179 : vector<32x128xf32>
    %cst_52 = arith.constant 14.4162598 : f32
    %181 = vector.broadcast %cst_52 : f32 to vector<32x128xf32>
    %182 = arith.mulf %181, %180 : vector<32x128xf32>
    %183 = arith.addf %162, %182 : vector<32x128xf32>
    %c16_i32_53 = arith.constant 16 : i32
    %184 = vector.broadcast %c16_i32_53 : i32 to vector<32x128xi32>
    %185 = arith.shrui %174, %184 : vector<32x128xi32>
    %186 = arith.sitofp %185 : vector<32x128xi32> to vector<32x128xf32>
    %cst_54 = arith.constant 0.00489807129 : f32
    %187 = vector.broadcast %cst_54 : f32 to vector<32x128xf32>
    %188 = arith.mulf %186, %187 : vector<32x128xf32>
    %189 = math.floor %188 : vector<32x128xf32>
    %cst_55 = arith.constant 21.6243896 : f32
    %190 = vector.broadcast %cst_55 : f32 to vector<32x128xf32>
    %191 = arith.mulf %190, %189 : vector<32x128xf32>
    %192 = arith.addf %183, %191 : vector<32x128xf32>
    %c0_56 = arith.constant 0 : index
    %c0_57 = arith.constant 0 : index
    %193 = vector.load %arg3[%c0_56, %c0_57] : memref<32x128xf32, #tpu.memory_space<vmem>>, vector<32x128xf32>
    tpu.vector_store %arg3[%c0_56, %c0_57], %192 {strides = array<i32>} : memref<32x128xf32, #tpu.memory_space<vmem>>, vector<32x128xf32>,
    %c64_i32 = arith.constant 64 : i32
    %194 = vector.broadcast %c64_i32 : i32 to vector<32x128xi32>
    %195 = arith.cmpi slt, %9, %194 : vector<32x128xi32>
    %cst_58 = arith.constant 3.000000e+38 : f32
    %196 = vector.broadcast %cst_58 : f32 to vector<32x128xf32>
    %197 = arith.select %195, %192, %196 : vector<32x128xi1>, vector<32x128xf32>
    %cst_59 = arith.constant dense<0x7F800000> : vector<128xf32>
    %198 = vector.multi_reduction <minimumf>, %197, %cst_59 [0] : vector<32x128xf32> to vector<128xf32>
    %199 = vector.shape_cast %198 : vector<128xf32> to vector<1x128xf32>
    %cst_60 = arith.constant 0.000000e+00 : f32
    %cst_61 = arith.constant 3.000000e+38 : f32
    %200 = arith.subf %cst_60, %cst_61 : f32
    %201 = vector.broadcast %200 : f32 to vector<32x128xf32>
    %202 = arith.select %195, %192, %201 : vector<32x128xi1>, vector<32x128xf32>
    %cst_62 = arith.constant dense<0xFF800000> : vector<128xf32>
    %203 = vector.multi_reduction <maximumf>, %202, %cst_62 [0] : vector<32x128xf32> to vector<128xf32>
    %204 = vector.shape_cast %203 : vector<128xf32> to vector<1x128xf32>
    %205 = tpu.concatenate %199, %204 in 0 : vector<1x128xf32>, vector<1x128xf32> -> vector<2x128xf32>
    %206 = vector.shape_cast %205 : vector<2x128xf32> to vector<1x2x128xf32>
    %c0_63 = arith.constant 0 : index
    %c0_64 = arith.constant 0 : index
    %c0_65 = arith.constant 0 : index
    %207 = vector.load %arg4[%c0_63, %c0_64, %c0_65] : memref<1x2x128xf32, #tpu.memory_space<vmem>>, vector<1x2x128xf32>
    tpu.vector_store %arg4[%c0_63, %c0_64, %c0_65], %206 {strides = array<i32>} : memref<1x2x128xf32, #tpu.memory_space<vmem>>, vector<1x2x128xf32>,
    return
  }
  func.func @transform_0(%arg0: i32) -> (i32, i32) {
    %c0_i32 = arith.constant 0 : i32
    %c0_i32_0 = arith.constant 0 : i32
    %c0_i32_1 = arith.constant 0 : i32
    return %c0_i32, %c0_i32_0 : i32, i32
  }
  func.func @transform_1(%arg0: i32) -> (i32, i32) {
    %c0_i32 = arith.constant 0 : i32
    %c0_i32_0 = arith.constant 0 : i32
    return %arg0, %c0_i32 : i32, i32
  }
  func.func @transform_2(%arg0: i32) -> (i32, i32) {
    %c0_i32 = arith.constant 0 : i32
    %c0_i32_0 = arith.constant 0 : i32
    return %arg0, %c0_i32 : i32, i32
  }
  func.func @transform_3(%arg0: i32) -> (i32, i32, i32) {
    %c0_i32 = arith.constant 0 : i32
    %c0_i32_0 = arith.constant 0 : i32
    %c0_i32_1 = arith.constant 0 : i32
    return %arg0, %c0_i32, %c0_i32_0 : i32, i32, i32
  }
}

</mosaic_0001>

<bundles_post_ra>
// kernel: tpu_custom_call.1
= control target key start
LH: loop header
LB: loop body
LE: loop exit
PB: predicated region body
PF: predicated region fallthrough
CT: control target
= control target key end

     0   :  { %9 = vsyncpa [#allocation3], 0  ;;  %s1363_s0 = inlined_call_operand.vmem [shape: f32[1,128], index: 0, kind: input, shape index: {}]   ;;  %s1364_s1 = inlined_call_operand.vmem [shape: f32[64,1], index: 1, kind: input, shape index: {}]   ;;  %s1365_s2 = inlined_call_operand.hbm [shape: f32[64,128], index: 2, kind: output, shape index: {0}]   ;;  %s1366_s3 = inlined_call_operand.hbm [shape: f32[2,2,128], index: 3, kind: output, shape index: {1}]  }
   0x1   :  { %11 = vsyncpa [#allocation3 + $0x1], 0 }
   0x2   :  { %12 = vsyncpa [#allocation5], 0 }
   0x3   :  { %14 = vsyncpa [#allocation5 + $0x1], 0  ;;  %s1046_s12 = smov 0   ;;  %s1048_s13 = smov 0  }
   0x4   :  { %s1050_s14 = smov 0   ;;  %s1052_s15 = smov 0  }
   0x5 LB: > { %s1067_s16 = sadd.s32 4294967295, %s1019_s15   ;;  %s858_s17 = sadd.s32 4294967294, %s1019_s15   ;;  %s1019_s15 = sphi %s1052_s15, %s1391_s15   ;;  %s1015_s14 = sphi %s1050_s14, %s1390_s14   ;;  %s1011_s13 = sphi %s1048_s13, %s1389_s13   ;;  %s1007_s12 = sphi %s1046_s12, %s1388_s12  }
   0x6   : > { %s1071_s18 = sadd.s32 1, %s1019_s15   ;;  %s74_s19 = sadd.s32 1, %s1015_s14 }
   0x7   : > { %s71_s20 = ssub.s32 %s1019_s15, %s1071_s18  ;;  %p84_p0 = scmp.ne.s32.totalorder %s1015_s14, %s1011_s13 }
   0x8   : > { %p72_p1 = scmp.eq.s32.totalorder %s71_s20, 0  ;;  %p85_p2 = scmp.eq.s32.totalorder %s1067_s16, 1 }
   0x9   : > { %p90_p3 = scmp.ne.s32.totalorder %s1011_s13, %s1007_s12  ;;  %p91_p4 = scmp.eq.s32.totalorder %s858_s17, 1 }
   0xa   : > { %s1082_s21 = scalar_select %p72_p1, %s1015_s14, %s74_s19  }
   0xb   : > { %p1084_p5 = por %p85_p2, %p84_p0  ;;  %p1088_p6 = por %p91_p4, %p90_p3 }
   0xc   : > { %p861_p7 = scmp.ge.s32.totalorder %s1019_s15, 1  ;;  %p147_p8 = scmp.lt.s32.totalorder %s1019_s15, 3 }
   0xe   : > { %p148_p9 = pnand %p861_p7, %p147_p8 }
  0x10   : > { %151 = sbr.rel (%p148_p9) target bundleno = 234 (0xea), region = 28 }
  0x17   : > { %s864_s24 = sshll.u32 %s1067_s16, 2  ;;  %v1021_v0 = vmov 0   ;;  %v218_v1 = vlaneseq  ;;  %s867_s29 = sshll.u32 %s1067_s16, 5 }
  0x18   : > { %924 = vset.pattern.permute.xlu1 %v1021_v0  ;;  %923 = vset.pattern.permute.xlu0 %v1021_v0  ;;  %p177_p10 = scmp.lt.s32.totalorder %s864_s24, 7  ;;  %v226_v8 = vstv %s867_s29  ;;  %s1260_s5 = sand.u32 1, %s1011_s13  }
  0x19   : > { %v219_v4 = vshrl.u32 %v218_v1, 7  ;;  %v1103_v10 = vand.u32 127, %v218_v1  ;;  %s862_s6 = sshll.u32 %s1260_s5, 5  ;;  %s875_s7 = sshll.u32 %s1067_s16, 9 }
  0x1a   : > { %s1393_s24 = smov (!%p177_p10, %s864_s24), 7  ;;  %s168_s8 = scalar_lea.vmem [#allocation2], %s862_s6 }
  0x1b   : > { %s865_s25 = sshll.u32 %s1393_s24, 3  ;;  %v221_v7 = vadd.s32 16, %v219_v4  ;;  %v1107_v19 = vadd.s32 %v226_v8, %v219_v4  ;;  %v222_v42 = vadd.s32 24, %v219_v4  ;;  %v220_v47 = vadd.s32 8, %v219_v4  ;;  %s751_s9 = sshll.u32 %s168_s8, 4  ;;  %s1282_s9 = int_to_ptr.vmem [resolvable:$true] %s751_s9 }
  0x1c   : > { %s180_s28 = scalar_lea.vmem %s1364_s1, %s865_s25  ;;  %s1280_s17 = scalar_lea.hbm %s1365_s2, %s875_s7 }
  0x1d   : > { %v186_v2 = vld [vmem:[%s180_s28 + $0x10] sm:$0xff]  ;;  %v184_v3 = vld [vmem:[%s180_s28] sm:$0xff]  ;;  %v187_v5 = vld [vmem:[%s180_s28 + $0x18] sm:$0xff]  ;;  %v1101_v9 = vadd.s32 %v226_v8, %v221_v7  ;;  %1375 = vst [vmem:[#allocation9_spill] sm:$0xff] %v1107_v19  ;;  %v231_v24 = vmul.u32 128, %v1107_v19  ;;  %v1115_v52 = vadd.s32 %v226_v8, %v222_v42  ;;  %v1117_v57 = vadd.s32 %v226_v8, %v220_v47  ;;  %s733_s19 = scalar_lea.sflag [#allocation3], %s1260_s5 }
  0x1e   : > { %206 = vperm.xlu1 %924, %v186_v2   ;;  %196 = vperm.xlu0 %923, %v184_v3   ;;  %v185_v6 = vld [vmem:[%s180_s28 + $0x8] sm:$0xff]  ;;  %s925_s20 = scalar_lea.vmem %s1282_s9, 512  ;;  %s1022_s24 = smov [#allocation2]  }
  0x1f   : > { %1374 = vst [vmem:[#allocation8_spill] sm:$0xff] %v1101_v9  ;;  %v233_v11 = vmul.u32 128, %v1101_v9  ;;  %v1111_v29 = vadd.s32 %v231_v24, %v1103_v10  ;;  %1376 = vst [vmem:[#allocation10_spill] sm:$0xff] %v1115_v52  ;;  %v234_v63 = vmul.u32 128, %v1115_v52  ;;  %p926_p11 = scmp.ne.s32.totalorder %s1282_s9, %s925_s20  ;;  %s929_s25 = sshll.u32 %s1022_s24, 4  ;;  %s930_s25 = int_to_ptr.vmem [resolvable:$false] %s929_s25 }
  0x20   : > { %1377 = vst [vmem:[#allocation11_spill] sm:$0xff] %v1117_v57  ;;  %v232_v7 = vmul.u32 128, %v1117_v57  ;;  %s931_s26 = scalar_lea.vmem %s930_s25, 1024  ;;  %p932_p0 = scmp.lt.s32.totalorder %s1282_s9, %s930_s25 }
  0x21   : > { %v237_v12 = vadd.s32 %v233_v11, %v1103_v10  ;;  %v239_v36 = vxor.u32 2137738985, %v1111_v29  ;;  %v315_v39 = vxor.u32 3778270512, %v1111_v29  ;;  %v391_v60 = vxor.u32 1123834743, %v1111_v29  ;;  %p927_p12 = pnand %p926_p11, %p1084_p5  ;;  %p933_p1 = scmp.lt.s32.totalorder %s931_s26, %s925_s20 }
  0x22   : > { %211 = vperm.xlu1 %924, %v187_v5   ;;  %201 = vperm.xlu0 %923, %v185_v6  }
  0x23   : > { %v241_v13 = vxor.u32 2137738985, %v237_v12  ;;  %v317_v14 = vxor.u32 3778270512, %v237_v12  ;;  %v393_v15 = vxor.u32 1123834743, %v237_v12  ;;  %p928_p13 = pneg %p927_p12  ;;  %p934_p2 = por %p933_p1, %p932_p0 }
  0x24   : > { %v469_v16 = vxor.u32 2764366270, %v237_v12  ;;  %v545_v31 = vxor.u32 109930501, %v237_v12  ;;  %v621_v33 = vxor.u32 1750462028, %v237_v12 }
  0x25   : > { %v245_v17 = vmul.u32 2246822507, %v241_v13  ;;  %v321_v18 = vmul.u32 2246822507, %v317_v14  ;;  %v467_v13 = vxor.u32 2764366270, %v1111_v29  ;;  %p935_p3 = pnand %p934_p2, %p928_p13 }
  0x26   : > { %v397_v20 = vmul.u32 2246822507, %v393_v15  ;;  %v473_v21 = vmul.u32 2246822507, %v469_v16 }
  0x27   : > { %v249_v22 = vshrl.u32 %v245_v17, 15  ;;  %v325_v23 = vshrl.u32 %v321_v18, 15  ;;  %v549_v38 = vmul.u32 2246822507, %v545_v31  ;;  %v625_v41 = vmul.u32 2246822507, %v621_v33 }
  0x28   : > { %v401_v25 = vshrl.u32 %v397_v20, 15  ;;  %v477_v26 = vshrl.u32 %v473_v21, 15  ;;  %v243_v45 = vmul.u32 2246822507, %v239_v36  ;;  %v319_v49 = vmul.u32 2246822507, %v315_v39 }
  0x29   : > { %v253_v27 = vxor.u32 %v249_v22, %v245_v17  ;;  %v329_v28 = vxor.u32 %v325_v23, %v321_v18  ;;  %v553_v48 = vshrl.u32 %v549_v38, 15  ;;  %v629_v51 = vshrl.u32 %v625_v41, 15 }
  0x2a   : > { %v405_v30 = vxor.u32 %v401_v25, %v397_v20  ;;  %v481_v32 = vxor.u32 %v477_v26, %v473_v21  ;;  %v247_v55 = vshrl.u32 %v243_v45, 15  ;;  %v323_v59 = vshrl.u32 %v319_v49, 15 }
  0x2b   : > { %v257_v34 = vmul.u32 3266489909, %v253_v27  ;;  %v333_v35 = vmul.u32 3266489909, %v329_v28  ;;  %v557_v58 = vxor.u32 %v553_v48, %v549_v38  ;;  %v633_v62 = vxor.u32 %v629_v51, %v625_v41 }
  0x2c   : > { %v409_v37 = vmul.u32 3266489909, %v405_v30  ;;  %v485_v40 = vmul.u32 3266489909, %v481_v32  ;;  %v251_v3 = vxor.u32 %v247_v55, %v243_v45  ;;  %v327_v8 = vxor.u32 %v323_v59, %v319_v49 }
  0x2d   : > { %v261_v43 = vshrl.u32 %v257_v34, 13  ;;  %v337_v44 = vshrl.u32 %v333_v35, 13  ;;  %v561_v11 = vmul.u32 3266489909, %v557_v58  ;;  %v395_v12 = vmul.u32 2246822507, %v391_v60 }
  0x2e   : > { %v413_v46 = vshrl.u32 %v409_v37, 13  ;;  %v489_v50 = vshrl.u32 %v485_v40, 13  ;;  %v637_v16 = vmul.u32 3266489909, %v633_v62  ;;  %v543_v17 = vxor.u32 109930501, %v1111_v29 }
  0x2f   : > { %v265_v53 = vxor.u32 %v261_v43, %v257_v34  ;;  %v341_v54 = vxor.u32 %v337_v44, %v333_v35  ;;  %v255_v22 = vmul.u32 3266489909, %v251_v3  ;;  %v619_v26 = vxor.u32 1750462028, %v1111_v29 }
  0x30   : > { %v417_v56 = vxor.u32 %v413_v46, %v409_v37  ;;  %v493_v61 = vxor.u32 %v489_v50, %v485_v40  ;;  %v565_v27 = vshrl.u32 %v561_v11, 13  ;;  %v331_v28 = vmul.u32 3266489909, %v327_v8 }
  0x31   : > { %v269_v0 = vand.u32 65535, %v265_v53  ;;  %v293_v1 = vshrl.u32 %v265_v53, 16  ;;  %v345_v2 = vand.u32 65535, %v341_v54  ;;  %v369_v4 = vshrl.u32 %v341_v54, 16 }
  0x32   : > { %v421_v5 = vand.u32 65535, %v417_v56  ;;  %v445_v6 = vshrl.u32 %v417_v56, 16  ;;  %v497_v14 = vand.u32 65535, %v493_v61  ;;  %v521_v15 = vshrl.u32 %v493_v61, 16 }
  0x33   : > { %v273_v18 = vcvt.s32.f32 %v269_v0  ;;  %v297_v20 = vcvt.s32.f32 %v293_v1  ;;  %v349_v21 = vcvt.s32.f32 %v345_v2  ;;  %v373_v23 = vcvt.s32.f32 %v369_v4 }
  0x34   : > { %v425_v24 = vcvt.s32.f32 %v421_v5  ;;  %v449_v25 = vcvt.s32.f32 %v445_v6  ;;  %v399_v30 = vshrl.u32 %v395_v12, 15  ;;  %v1126_v31 = vadd.s32 %v234_v63, %v1103_v10 }
  0x35   : > { %v501_v32 = vcvt.s32.f32 %v497_v14  ;;  %v525_v33 = vcvt.s32.f32 %v521_v15  ;;  %v641_v34 = vshrl.u32 %v637_v16, 13  ;;  %v1129_v35 = vadd.s32 %v232_v7, %v1103_v10 }
  0x36   : > { %v277_v36 = vmul.f32 0.0048980713, %v273_v18  ;;  %v301_v37 = vmul.f32 0.0048980713, %v297_v20  ;;  %v353_v38 = vmul.f32 0.0048980713, %v349_v21  ;;  %v259_v39 = vshrl.u32 %v255_v22, 13 }
  0x37   : > { %v377_v40 = vmul.f32 0.0048980713, %v373_v23  ;;  %v429_v41 = vmul.f32 0.0048980713, %v425_v24  ;;  %v453_v42 = vmul.f32 0.0048980713, %v449_v25  ;;  %v471_v29 = vmul.u32 2246822507, %v467_v13 }
  0x38   : > { %v569_v43 = vxor.u32 %v565_v27, %v561_v11  ;;  %v335_v44 = vshrl.u32 %v331_v28, 13  ;;  %v403_v45 = vxor.u32 %v399_v30, %v395_v12  ;;  %v242_v46 = vxor.u32 2137738985, %v1126_v31 }
  0x39   : > { %v505_v47 = vmul.f32 0.0048980713, %v501_v32  ;;  %v529_v48 = vmul.f32 0.0048980713, %v525_v33  ;;  %v1132_v49 = vxor.u32 %v641_v34, %v637_v16  ;;  %v318_v10 = vxor.u32 3778270512, %v1126_v31 }
  0x3a   : > { %v281_v50 = vfloor.f32 %v277_v36  ;;  %v305_v51 = vfloor.f32 %v301_v37  ;;  %v357_v53 = vfloor.f32 %v353_v38  ;;  %v263_v54 = vxor.u32 %v259_v39, %v255_v22 }
  0x3b   : > { %v381_v55 = vfloor.f32 %v377_v40  ;;  %v433_v56 = vfloor.f32 %v429_v41  ;;  %v457_v58 = vfloor.f32 %v453_v42  ;;  %v475_v59 = vshrl.u32 %v471_v29, 15 }
  0x3c   : > { %v573_v60 = vand.u32 65535, %v569_v43  ;;  %v339_v61 = vxor.u32 %v335_v44, %v331_v28  ;;  %v407_v62 = vmul.u32 3266489909, %v403_v45  ;;  %v547_v63 = vmul.u32 2246822507, %v543_v17 }
  0x3d   : > { %v597_v0 = vshrl.u32 %v569_v43, 16  ;;  %v649_v1 = vand.u32 65535, %v1132_v49  ;;  %v623_v2 = vmul.u32 2246822507, %v619_v26  ;;  %v246_v3 = vmul.u32 2246822507, %v242_v46 }
  0x3e   : > { %v1136_v4 = vmul.f32 0.25, %v281_v50  ;;  %v509_v5 = vfloor.f32 %v505_v47  ;;  %v533_v6 = vfloor.f32 %v529_v48  ;;  %v267_v7 = vand.u32 65535, %v263_v54 }
  0x3f   : > { %v1138_v11 = vmul.f32 0.375, %v305_v51  ;;  %v1140_v8 = vmul.f32 0.5625, %v357_v53  ;;  %v291_v12 = vshrl.u32 %v263_v54, 16  ;;  %v479_v13 = vxor.u32 %v475_v59, %v471_v29 }
  0x40   : > { %v577_v14 = vcvt.s32.f32 %v573_v60  ;;  %v343_v15 = vand.u32 65535, %v339_v61  ;;  %v411_v16 = vshrl.u32 %v407_v62, 13  ;;  %v551_v17 = vshrl.u32 %v547_v63, 15 }
  0x41   : > { %v601_v18 = vcvt.s32.f32 %v597_v0  ;;  %v653_v20 = vcvt.s32.f32 %v649_v1  ;;  %v627_v21 = vshrl.u32 %v623_v2, 15  ;;  %v250_v22 = vshrl.u32 %v246_v3, 15 }
  0x42   : > { %v1142_v23 = vmul.f32 0.84375, %v381_v55  ;;  %v271_v24 = vcvt.s32.f32 %v267_v7  ;;  %v367_v25 = vshrl.u32 %v339_v61, 16  ;;  %v322_v26 = vmul.u32 2246822507, %v318_v10 }
  0x43   : > { %v1144_v27 = vmul.f32 1.265625, %v433_v56  ;;  %v1146_v28 = vmul.f32 1.8984375, %v457_v58  ;;  %v295_v30 = vcvt.s32.f32 %v291_v12  ;;  %v483_v32 = vmul.u32 3266489909, %v479_v13 }
  0x44   : > { %v581_v33 = vmul.f32 0.0048980713, %v577_v14  ;;  %v347_v34 = vcvt.s32.f32 %v343_v15  ;;  %v415_v36 = vxor.u32 %v411_v16, %v407_v62  ;;  %v555_v37 = vxor.u32 %v551_v17, %v547_v63 }
  0x45   : > { %v605_v38 = vmul.f32 0.0048980713, %v601_v18  ;;  %v657_v39 = vmul.f32 0.0048980713, %v653_v20  ;;  %v631_v40 = vxor.u32 %v627_v21, %v623_v2  ;;  %v254_v41 = vxor.u32 %v250_v22, %v246_v3 }
  0x46   : > { %v1148_v42 = vmul.f32 2.8476563, %v509_v5  ;;  %v275_v29 = vmul.f32 0.0048980713, %v271_v24  ;;  %v371_v43 = vcvt.s32.f32 %v367_v25  ;;  %v326_v44 = vshrl.u32 %v322_v26, 15 }
  0x47   : > { %v1150_v45 = vmul.f32 4.2714844, %v533_v6  ;;  %v299_v46 = vmul.f32 0.0048980713, %v295_v30  ;;  %v487_v47 = vshrl.u32 %v483_v32, 13  ;;  %v394_v48 = vxor.u32 1123834743, %v1126_v31 }
  0x48   : > { %v585_v10 = vfloor.f32 %v581_v33  ;;  %v351_v50 = vmul.f32 0.0048980713, %v347_v34  ;;  %v419_v51 = vand.u32 65535, %v415_v36  ;;  %v559_v53 = vmul.u32 3266489909, %v555_v37 }
  0x49   : > { %v609_v54 = vfloor.f32 %v605_v38  ;;  %v661_v55 = vfloor.f32 %v657_v39  ;;  %v635_v56 = vmul.u32 3266489909, %v631_v40  ;;  %v258_v58 = vmul.u32 3266489909, %v254_v41 }
  0x4a   : > { %v279_v59 = vfloor.f32 %v275_v29  ;;  %v375_v60 = vmul.f32 0.0048980713, %v371_v43  ;;  %v330_v61 = vxor.u32 %v326_v44, %v322_v26  ;;  %v470_v62 = vxor.u32 2764366270, %v1126_v31 }
  0x4b   : > { %v303_v63 = vfloor.f32 %v299_v46  ;;  %v443_v0 = vshrl.u32 %v415_v36, 16  ;;  %v491_v1 = vxor.u32 %v487_v47, %v483_v32  ;;  %v398_v2 = vmul.u32 2246822507, %v394_v48 }
  0x4c   : > { %v1154_v3 = vmul.f32 6.4072266, %v585_v10  ;;  %v355_v5 = vfloor.f32 %v351_v50  ;;  %v423_v6 = vcvt.s32.f32 %v419_v51  ;;  %v563_v7 = vshrl.u32 %v559_v53, 13 }
  0x4d   : > { %v1156_v12 = vmul.f32 9.61084, %v609_v54  ;;  %v1158_v13 = vmul.f32 14.41626, %v661_v55  ;;  %v639_v14 = vshrl.u32 %v635_v56, 13  ;;  %v262_v15 = vshrl.u32 %v258_v58, 13 }
  0x4e   : > { %v379_v16 = vfloor.f32 %v375_v60  ;;  %v334_v17 = vmul.u32 3266489909, %v330_v61  ;;  %v474_v18 = vmul.u32 2246822507, %v470_v62  ;;  %v546_v20 = vxor.u32 109930501, %v1126_v31 }
  0x4f   : > { %1378 = vst [vmem:[#allocation12_spill] sm:$0xff] %v1158_v13  ;;  %v447_v21 = vcvt.s32.f32 %v443_v0  ;;  %v495_v22 = vand.u32 65535, %v491_v1  ;;  %v519_v24 = vshrl.u32 %v491_v1, 16  ;;  %v402_v25 = vshrl.u32 %v398_v2, 15 }
  0x50   : > { %v1161_v26 = vmul.f32 0.25, %v279_v59  ;;  %v427_v30 = vmul.f32 0.0048980713, %v423_v6  ;;  %v567_v32 = vxor.u32 %v563_v7, %v559_v53  ;;  %v240_v33 = vxor.u32 2137738985, %v1129_v35 }
  0x51   : > { %v1164_v34 = vmul.f32 0.375, %v303_v63  ;;  %v1166_v36 = vmul.f32 0.5625, %v355_v5  ;;  %v1168_v37 = vxor.u32 %v639_v14, %v635_v56  ;;  %v266_v38 = vxor.u32 %v262_v15, %v258_v58 }
  0x52   : > { %v338_v39 = vshrl.u32 %v334_v17, 13  ;;  %v478_v40 = vshrl.u32 %v474_v18, 15  ;;  %v550_v41 = vmul.u32 2246822507, %v546_v20  ;;  %v316_v29 = vxor.u32 3778270512, %v1129_v35 }
  0x53   : > { %v451_v43 = vmul.f32 0.0048980713, %v447_v21  ;;  %v499_v44 = vcvt.s32.f32 %v495_v22  ;;  %v523_v46 = vcvt.s32.f32 %v519_v24  ;;  %v406_v47 = vxor.u32 %v402_v25, %v398_v2 }
  0x54   : > { %v431_v48 = vfloor.f32 %v427_v30  ;;  %v571_v10 = vand.u32 65535, %v567_v32  ;;  %v595_v50 = vshrl.u32 %v567_v32, 16  ;;  %v244_v51 = vmul.u32 2246822507, %v240_v33 }
  0x55   : > { %v1171_v53 = vmul.f32 0.84375, %v379_v16  ;;  %v647_v54 = vand.u32 65535, %v1168_v37  ;;  %v270_v55 = vand.u32 65535, %v266_v38  ;;  %v622_v56 = vxor.u32 1750462028, %v1126_v31 }
  0x56   : > { %v1175_v58 = vxor.u32 %v338_v39, %v334_v17  ;;  %v482_v59 = vxor.u32 %v478_v40, %v474_v18  ;;  %v554_v60 = vshrl.u32 %v550_v41, 15  ;;  %v320_v61 = vmul.u32 2246822507, %v316_v29 }
  0x57   : > { %v455_v62 = vfloor.f32 %v451_v43  ;;  %v503_v63 = vmul.f32 0.0048980713, %v499_v44  ;;  %v527_v0 = vmul.f32 0.0048980713, %v523_v46  ;;  %v410_v1 = vmul.u32 3266489909, %v406_v47 }
  0x58   : > { %v1177_v2 = vmul.f32 1.265625, %v431_v48  ;;  %v575_v5 = vcvt.s32.f32 %v571_v10  ;;  %v599_v6 = vcvt.s32.f32 %v595_v50  ;;  %v248_v7 = vshrl.u32 %v244_v51, 15 }
  0x59   : > { %v651_v14 = vcvt.s32.f32 %v647_v54  ;;  %v274_v15 = vcvt.s32.f32 %v270_v55  ;;  %v294_v16 = vshrl.u32 %v266_v38, 16  ;;  %v626_v20 = vmul.u32 2246822507, %v622_v56 }
  0x5a   : > { %v346_v31 = vand.u32 65535, %v1175_v58  ;;  %v486_v17 = vmul.u32 3266489909, %v482_v59  ;;  %v558_v21 = vxor.u32 %v554_v60, %v550_v41  ;;  %v324_v18 = vshrl.u32 %v320_v61, 15 }
  0x5b   : > { %v1180_v22 = vmul.f32 1.8984375, %v455_v62  ;;  %v507_v24 = vfloor.f32 %v503_v63  ;;  %v531_v25 = vfloor.f32 %v527_v0  ;;  %v392_v30 = vxor.u32 1123834743, %v1129_v35 }
  0x5c   : > { %v579_v32 = vmul.f32 0.0048980713, %v575_v5  ;;  %v603_v33 = vmul.f32 0.0048980713, %v599_v6  ;;  %v414_v39 = vshrl.u32 %v410_v1, 13  ;;  %v252_v40 = vxor.u32 %v248_v7, %v244_v51 }
  0x5d   : > { %v655_v29 = vmul.f32 0.0048980713, %v651_v14  ;;  %v278_v43 = vmul.f32 0.0048980713, %v274_v15  ;;  %v298_v44 = vcvt.s32.f32 %v294_v16  ;;  %v630_v38 = vshrl.u32 %v626_v20, 15 }
  0x5e   : > { %v350_v46 = vcvt.s32.f32 %v346_v31  ;;  %v490_v47 = vshrl.u32 %v486_v17, 13  ;;  %v562_v48 = vmul.u32 3266489909, %v558_v21  ;;  %v328_v10 = vxor.u32 %v324_v18, %v320_v61 }
  0x5f   : > { %v1183_v41 = vmul.f32 2.8476563, %v507_v24  ;;  %v1185_v50 = vmul.f32 4.2714844, %v531_v25  ;;  %v396_v54 = vmul.u32 2246822507, %v392_v30  ;;  %v468_v55 = vxor.u32 2764366270, %v1129_v35 }
  0x60   : > { %v583_v56 = vfloor.f32 %v579_v32  ;;  %v607_v59 = vfloor.f32 %v603_v33  ;;  %v418_v60 = vxor.u32 %v414_v39, %v410_v1  ;;  %v256_v62 = vmul.u32 3266489909, %v252_v40 }
  0x61   : > { %v659_v51 = vfloor.f32 %v655_v29  ;;  %v282_v63 = vfloor.f32 %v278_v43  ;;  %v302_v0 = vmul.f32 0.0048980713, %v298_v44  ;;  %v634_v5 = vxor.u32 %v630_v38, %v626_v20 }
  0x62   : > { %v354_v6 = vmul.f32 0.0048980713, %v350_v46  ;;  %v494_v7 = vxor.u32 %v490_v47, %v486_v17  ;;  %v566_v14 = vshrl.u32 %v562_v48, 13  ;;  %v332_v15 = vmul.u32 3266489909, %v328_v10 }
  0x63   : > { %v370_v61 = vshrl.u32 %v1175_v58, 16  ;;  %v400_v16 = vshrl.u32 %v396_v54, 15  ;;  %v472_v31 = vmul.u32 2246822507, %v468_v55  ;;  %v544_v21 = vxor.u32 109930501, %v1129_v35 }
  0x64   : > { %v1190_v18 = vmul.f32 6.4072266, %v583_v56  ;;  %v1192_v24 = vmul.f32 9.61084, %v607_v59  ;;  %v422_v1 = vand.u32 65535, %v418_v60  ;;  %v260_v25 = vshrl.u32 %v256_v62, 13 }
  0x65   : > { %v1194_v30 = vmul.f32 14.41626, %v659_v51  ;;  %v306_v32 = vfloor.f32 %v302_v0  ;;  %v446_v20 = vshrl.u32 %v418_v60, 16  ;;  %v638_v33 = vmul.u32 3266489909, %v634_v5 }
  0x66   : > { %v358_v17 = vfloor.f32 %v354_v6  ;;  %v498_v39 = vand.u32 65535, %v494_v7  ;;  %v570_v40 = vxor.u32 %v566_v14, %v562_v48  ;;  %v336_v29 = vshrl.u32 %v332_v15, 13 }
  0x67   : > { %1379 = vst [vmem:[#allocation13_spill] sm:$0xff] %v1194_v30  ;;  %v404_v58 = vxor.u32 %v400_v16, %v396_v54  ;;  %v476_v43 = vshrl.u32 %v472_v31, 15  ;;  %v548_v44 = vmul.u32 2246822507, %v544_v21  ;;  %v620_v38 = vxor.u32 1750462028, %v1129_v35 }
  0x68   : > { %v1197_v46 = vmul.f32 0.25, %v282_v63  ;;  %v374_v47 = vcvt.s32.f32 %v370_v61  ;;  %v426_v10 = vcvt.s32.f32 %v422_v1  ;;  %v264_v55 = vxor.u32 %v260_v25, %v256_v62 }
  0x69   : > { %v1199_v56 = vmul.f32 0.375, %v306_v32  ;;  %v450_v59 = vcvt.s32.f32 %v446_v20  ;;  %v522_v51 = vshrl.u32 %v494_v7, 16  ;;  %v642_v60 = vshrl.u32 %v638_v33, 13 }
  0x6a   : > { %v1201_v0 = vmul.f32 0.5625, %v358_v17  ;;  %v502_v5 = vcvt.s32.f32 %v498_v39  ;;  %v574_v48 = vand.u32 65535, %v570_v40  ;;  %v340_v6 = vxor.u32 %v336_v29, %v332_v15 }
  0x6b   : > { %v408_v54 = vmul.u32 3266489909, %v404_v58  ;;  %v480_v14 = vxor.u32 %v476_v43, %v472_v31  ;;  %v552_v16 = vshrl.u32 %v548_v44, 15  ;;  %v624_v21 = vmul.u32 2246822507, %v620_v38 }
  0x6c   : > { %v378_v35 = vmul.f32 0.0048980713, %v374_v47  ;;  %v430_v63 = vmul.f32 0.0048980713, %v426_v10  ;;  %v598_v52 = vshrl.u32 %v570_v40, 16  ;;  %v268_v61 = vand.u32 65535, %v264_v55 }
  0x6d   : > { %v454_v1 = vmul.f32 0.0048980713, %v450_v59  ;;  %v526_v62 = vcvt.s32.f32 %v522_v51  ;;  %v1203_v25 = vxor.u32 %v642_v60, %v638_v33  ;;  %v292_v32 = vshrl.u32 %v264_v55, 16 }
  0x6e   : > { %v506_v7 = vmul.f32 0.0048980713, %v502_v5  ;;  %v578_v20 = vcvt.s32.f32 %v574_v48  ;;  %v344_v17 = vand.u32 65535, %v340_v6  ;;  %v368_v57 = vshrl.u32 %v340_v6, 16 }
  0x6f   : > { %v412_v39 = vshrl.u32 %v408_v54, 13  ;;  %v484_v9 = vmul.u32 3266489909, %v480_v14  ;;  %v556_v15 = vxor.u32 %v552_v16, %v548_v44  ;;  %v628_v29 = vshrl.u32 %v624_v21, 15 }
  0x70   : > { %v382_v31 = vfloor.f32 %v378_v35  ;;  %v434_v58 = vfloor.f32 %v430_v63  ;;  %v602_v43 = vcvt.s32.f32 %v598_v52  ;;  %v272_v38 = vcvt.s32.f32 %v268_v61 }
  0x71   : > { %v458_v47 = vfloor.f32 %v454_v1  ;;  %v530_v40 = vmul.f32 0.0048980713, %v526_v62  ;;  %v650_v10 = vand.u32 65535, %v1203_v25  ;;  %v296_v59 = vcvt.s32.f32 %v292_v32 }
  0x72   : > { %v510_v33 = vfloor.f32 %v506_v7  ;;  %v582_v51 = vmul.f32 0.0048980713, %v578_v20  ;;  %v348_v55 = vcvt.s32.f32 %v344_v17  ;;  %v372_v60 = vcvt.s32.f32 %v368_v57 }
  0x73   : > { %v416_v5 = vxor.u32 %v412_v39, %v408_v54  ;;  %v488_v48 = vshrl.u32 %v484_v9, 13  ;;  %v560_v6 = vmul.u32 3266489909, %v556_v15  ;;  %v632_v19 = vxor.u32 %v628_v29, %v624_v21 }
  0x74   : > { %v1206_v14 = vmul.f32 0.84375, %v382_v31  ;;  %v1208_v44 = vmul.f32 1.265625, %v434_v58  ;;  %v606_v16 = vmul.f32 0.0048980713, %v602_v43  ;;  %v276_v52 = vmul.f32 0.0048980713, %v272_v38 }
  0x75   : > { %v1210_v35 = vmul.f32 1.8984375, %v458_v47  ;;  %v534_v63 = vfloor.f32 %v530_v40  ;;  %v654_v61 = vcvt.s32.f32 %v650_v10  ;;  %v300_v1 = vmul.f32 0.0048980713, %v296_v59 }
  0x76   : > { %v1212_v62 = vmul.f32 2.8476563, %v510_v33  ;;  %v586_v32 = vfloor.f32 %v582_v51  ;;  %v352_v7 = vmul.f32 0.0048980713, %v348_v55  ;;  %v376_v57 = vmul.f32 0.0048980713, %v372_v60 }
  0x77   : > { %v420_v54 = vand.u32 65535, %v416_v5  ;;  %v492_v20 = vxor.u32 %v488_v48, %v484_v9  ;;  %v564_v17 = vshrl.u32 %v560_v6, 13  ;;  %v636_v21 = vmul.u32 3266489909, %v632_v19  ;;  %v866_v19 = vld [vmem:[%s1363_s0] ss:$0 sm:$0xff] }
  0x78   : > { %v610_v39 = vfloor.f32 %v606_v16  ;;  %v280_v15 = vfloor.f32 %v276_v52  ;;  %v671_v29 = vshrl.u32 %v1168_v37, 16  ;;  %v673_v31 = vshrl.u32 %v1132_v49, 16 }
  0x79   : > { %v1216_v58 = vmul.f32 4.2714844, %v534_v63  ;;  %v304_v43 = vfloor.f32 %v300_v1  ;;  %v444_v38 = vshrl.u32 %v416_v5, 16  ;;  %v674_v47 = vshrl.u32 %v1203_v25, 16 }
  0x7a   : > { %v1219_v40 = vmul.f32 6.4072266, %v586_v32  ;;  %v1221_v10 = vmul.f32 0.0048980713, %v654_v61  ;;  %v356_v59 = vfloor.f32 %v352_v7  ;;  %v380_v9 = vfloor.f32 %v376_v57 }
  0x7b   : > { %v424_v33 = vcvt.s32.f32 %v420_v54  ;;  %v496_v37 = vand.u32 65535, %v492_v20  ;;  %v568_v51 = vxor.u32 %v564_v17, %v560_v6  ;;  %v640_v49 = vshrl.u32 %v636_v21, 13 }
  0x7c   : > { %1380 = vst [vmem:[#allocation14_spill] sm:$0xff] %v1219_v40  ;;  %v1226_v55 = vmul.f32 9.61084, %v610_v39  ;;  %v284_v60 = vmul.f32 0.25, %v280_v15  ;;  %v675_v5 = vcvt.s32.f32 %v671_v29  ;;  %v677_v48 = vcvt.s32.f32 %v673_v31 }
  0x7d   : > { %v308_v52 = vmul.f32 0.375, %v304_v43  ;;  %v448_v63 = vcvt.s32.f32 %v444_v38  ;;  %v520_v61 = vshrl.u32 %v492_v20, 16  ;;  %v678_v1 = vcvt.s32.f32 %v674_v47 }
  0x7e   : > { %v360_v57 = vmul.f32 0.5625, %v356_v59  ;;  %v384_v40 = vmul.f32 0.84375, %v380_v9  ;;  %v428_v30 = vmul.f32 0.0048980713, %v424_v33  ;;  %v500_v54 = vcvt.s32.f32 %v496_v37 }
  0x7f   : > { %v572_v13 = vand.u32 65535, %v568_v51  ;;  %v644_v6 = vxor.u32 %v640_v49, %v636_v21  ;;  %v1230_v15 = vmul.f32 0.0048980713, %v675_v5  ;;  %v1232_v29 = vmul.f32 0.0048980713, %v677_v48 }
  0x80   : > { %v452_v43 = vmul.f32 0.0048980713, %v448_v63  ;;  %v524_v20 = vcvt.s32.f32 %v520_v61  ;;  %v596_v38 = vshrl.u32 %v568_v51, 16  ;;  %v504_v37 = vmul.f32 0.0048980713, %v500_v54 }
  0x81   : > { %v648_v49 = vand.u32 65535, %v644_v6 }
  0x82   : > { %v456_v63 = vfloor.f32 %v452_v43  ;;  %v528_v61 = vmul.f32 0.0048980713, %v524_v20 }
  0x9d   : > { %v207_v25 = vpop.permute.xlu1 %206  ;;  %v197_v16 = vpop.permute.xlu0 %196 }
  0x9e   : > { %v216_v32 = vadd.f32 %v866_v19, %v207_v25  ;;  %v214_v7 = vadd.f32 %v866_v19, %v197_v16  ;;  %v1234_v25 = vmul.f32 0.0048980713, %v678_v1  ;;  %v600_v1 = vcvt.s32.f32 %v596_v38 }
  0xa0   : > { %v289_v17 = vadd.f32 %v1136_v4, %v216_v32  ;;  %v287_v39 = vadd.f32 %v1161_v26, %v214_v7  ;;  %v432_v4 = vfloor.f32 %v428_v30  ;;  %v576_v26 = vcvt.s32.f32 %v572_v13 }
  0xa1   : > { %v212_v31 = vpop.permute.xlu1 %211  ;;  %v202_v47 = vpop.permute.xlu0 %201  ;;  %v672_v32 = vshrl.u32 %v644_v6, 16  ;;  %v508_v7 = vfloor.f32 %v504_v37  ;;  %v532_v6 = vfloor.f32 %v528_v61  ;;  %v1382_v61 = vld [vmem:[#allocation13_spill] sm:$0xff] }
  0xa2   : > { %v313_v59 = vadd.f32 %v1138_v11, %v289_v17  ;;  %v311_v9 = vadd.f32 %v1164_v34, %v287_v39  ;;  %v217_v21 = vadd.f32 %v866_v19, %v212_v31  ;;  %v215_v33 = vadd.f32 %v866_v19, %v202_v47 }
  0xa3   : > { %v436_v13 = vmul.f32 1.265625, %v432_v4  ;;  %v580_v54 = vmul.f32 0.0048980713, %v576_v26  ;;  %v460_v39 = vmul.f32 1.8984375, %v456_v63  ;;  %v604_v31 = vmul.f32 0.0048980713, %v600_v1  ;;  %v1381_v63 = vld [vmem:[#allocation12_spill] sm:$0xff]  ;;  %v1383_v1 = vld [vmem:[#allocation14_spill] sm:$0xff] }
  0xa4   : > { %v365_v5 = vadd.f32 %v1140_v8, %v313_v59  ;;  %v363_v48 = vadd.f32 %v1166_v36, %v311_v9  ;;  %v290_v16 = vadd.f32 %v1197_v46, %v217_v21  ;;  %v288_v51 = vadd.f32 %v284_v60, %v215_v33 }
  0xa5   : > { %v652_v8 = vcvt.s32.f32 %v648_v49  ;;  %v512_v20 = vmul.f32 2.8476563, %v508_v7  ;;  %v584_v38 = vfloor.f32 %v580_v54  ;;  %v536_v9 = vmul.f32 4.2714844, %v532_v6 }
  0xa6   : > { %v389_v11 = vadd.f32 %v1142_v23, %v365_v5  ;;  %v387_v34 = vadd.f32 %v1171_v53, %v363_v48  ;;  %v314_v30 = vadd.f32 %v1199_v56, %v290_v16  ;;  %v312_v19 = vadd.f32 %v308_v52, %v288_v51 }
  0xa7   : > { %v676_v23 = vcvt.s32.f32 %v672_v32  ;;  %v656_v47 = vmul.f32 0.0048980713, %v652_v8  ;;  %v662_v4 = vfloor.f32 %v1221_v10  ;;  %v1385_v8 = vld [vmem:[#allocation8_spill] sm:$0xff] }
  0xa8   : > { %v441_v36 = vadd.f32 %v1144_v27, %v389_v11  ;;  %v439_v46 = vadd.f32 %v1177_v2, %v387_v34  ;;  %v366_v60 = vadd.f32 %v1201_v0, %v314_v30  ;;  %v364_v17 = vadd.f32 %v360_v57, %v312_v19 }
  0xa9   : > { %v683_v27 = vfloor.f32 %v1230_v15  ;;  %v680_v21 = vmul.f32 0.0048980713, %v676_v23  ;;  %v660_v37 = vfloor.f32 %v656_v47  ;;  %vm701_vm1 = vcmp.lt.s32.totalorder %v1385_v8, 64 }
  0xaa   : > { %v465_v53 = vadd.f32 %v1146_v28, %v441_v36  ;;  %v463_v56 = vadd.f32 %v1180_v22, %v439_v46  ;;  %v390_v52 = vadd.f32 %v1206_v14, %v366_v60  ;;  %v388_v43 = vadd.f32 %v384_v40, %v364_v17  ;;  %v1387_v36 = vld [vmem:[#allocation10_spill] sm:$0xff] }
  0xab   : > { %v608_v28 = vfloor.f32 %v604_v31  ;;  %v685_v22 = vfloor.f32 %v1232_v29  ;;  %v684_v49 = vfloor.f32 %v680_v21  ;;  %vm702_vm3 = vcmp.lt.s32.totalorder %v1387_v36, 64 }
  0xac   : > { %v517_v2 = vadd.f32 %v1148_v42, %v465_v53  ;;  %v515_v0 = vadd.f32 %v1183_v41, %v463_v56  ;;  %v442_v57 = vadd.f32 %v1208_v44, %v390_v52  ;;  %v440_v59 = vadd.f32 %v436_v13, %v388_v43 }
  0xad   : > { %v588_v42 = vmul.f32 6.4072266, %v584_v38  ;;  %v686_v41 = vfloor.f32 %v1234_v25  ;;  %v689_v5 = vmul.f32 21.62439, %v685_v22  ;;  %v666_v25 = vmul.f32 14.41626, %v662_v4 }
  0xae   : > { %v541_v14 = vadd.f32 %v1150_v45, %v517_v2  ;;  %v539_v40 = vadd.f32 %v1185_v50, %v515_v0  ;;  %v466_v33 = vadd.f32 %v1210_v35, %v442_v57  ;;  %v464_v15 = vadd.f32 %v460_v39, %v440_v59 }
  0xaf   : > { %v612_v50 = vmul.f32 9.61084, %v608_v28  ;;  %v687_v35 = vmul.f32 21.62439, %v683_v27  ;;  %v688_v34 = vmul.f32 21.62439, %v684_v49 }
  0xb0   : > { %v593_v44 = vadd.f32 %v1154_v3, %v541_v14  ;;  %v591_v29 = vadd.f32 %v1190_v18, %v539_v40  ;;  %v518_v45 = vadd.f32 %v1212_v62, %v466_v33  ;;  %v516_v26 = vadd.f32 %v512_v20, %v464_v15 }
  0xb1   : > { %v664_v3 = vmul.f32 14.41626, %v660_v37  ;;  %v690_v30 = vmul.f32 21.62439, %v686_v41 }
  0xb2   : > { %v617_v10 = vadd.f32 %v1156_v12, %v593_v44  ;;  %v615_v48 = vadd.f32 %v1192_v24, %v591_v29  ;;  %v542_v16 = vadd.f32 %v1216_v58, %v518_v45  ;;  %v540_v51 = vadd.f32 %v536_v9, %v516_v26  ;;  %v1384_v58 = vld [vmem:[#allocation9_spill] sm:$0xff] }
  0xb3   : > { %vm699_vm0 = vcmp.lt.s32.totalorder %v1384_v58, 64 }
  0xb4   : > { %v669_v18 = vadd.f32 %v1381_v63, %v617_v10  ;;  %v667_v62 = vadd.f32 %v1382_v61, %v615_v48  ;;  %v594_v32 = vadd.f32 %v1383_v1, %v542_v16  ;;  %v592_v11 = vadd.f32 %v588_v42, %v540_v51 }
  0xb6   : > { %v618_v12 = vadd.f32 %v1226_v55, %v594_v32  ;;  %v616_v19 = vadd.f32 %v612_v50, %v592_v11  ;;  %v691_v24 = vadd.f32 %v687_v35, %v667_v62  ;;  %v693_v13 = vadd.f32 %v689_v5, %v669_v18  ;;  %v1386_v55 = vld [vmem:[#allocation11_spill] sm:$0xff] }
  0xb7   : > { %vm700_vm2 = vcmp.lt.s32.totalorder %v1386_v55, 64 }
  0xb8   : > { %v670_v7 = vadd.f32 %v666_v25, %v618_v12  ;;  %v668_v54 = vadd.f32 %v664_v3, %v616_v19  ;;  %695 = vst [vmem:[%s168_s8] sm:$0xff] %v691_v24  ;;  %697 = vst [vmem:[%s168_s8 + $0x10] sm:$0xff] %v693_v13  ;;  %v703_v17 = vsel %vm699_vm0, %v691_v24, 3e+38  ;;  %v705_v39 = vsel %vm701_vm1, %v693_v13, 3e+38 }
  0xb9   : > { %v716_v6 = vsel %vm699_vm0, %v691_v24, -3e+38  ;;  %v718_v31 = vsel %vm701_vm1, %v693_v13, -3e+38 }
  0xba   : > { %v692_v46 = vadd.f32 %v688_v34, %v668_v54  ;;  %v694_v60 = vadd.f32 %v690_v30, %v670_v7 }
  0xbc   : > { %696 = vst [vmem:[%s168_s8 + $0x8] sm:$0xff] %v692_v46  ;;  %698 = vst [vmem:[%s168_s8 + $0x18] sm:$0xff] %v694_v60  ;;  %v704_v23 = vsel %vm700_vm2, %v692_v46, 3e+38  ;;  %v706_v53 = vsel %vm702_vm3, %v694_v60, 3e+38 }
  0xbd   : > { %v717_v56 = vsel %vm700_vm2, %v692_v46, -3e+38 }
  0xbe   : > { %938 = shalt.err (!%p935_p3)
}
  0xbf   : > { %s939_s27 = scalar_lea.hbm %s1280_s17, 512  ;;  %s943_s4 = scalar_lea.hbm %s1365_s2, 1024 }
  0xc0   : > { %p940_p4 = scmp.ne.s32.totalorder %s1280_s17, %s939_s27  ;;  %p944_p9 = scmp.lt.u32.totalorder %s1280_s17, %s1365_s2 }
  0xc1   : > { %p945_p10 = scmp.lt.u32.totalorder %s943_s4, %s939_s27  ;;  %p947_p12 = scmp.lt.u32.totalorder %s939_s27, %s1280_s17 }
  0xc2   : > { %p941_p7 = pnand %p940_p4, %p1084_p5 }
  0xc3   : > { %p946_p11 = por %p945_p10, %p944_p9 }
  0xc4   : > { %p942_p8 = pneg %p941_p7 }
  0xc5   : > { %p948_p13 = por %p947_p12, %p946_p11 }
  0xc7   : > { %p949_p0 = pnand %p948_p13, %p942_p8 }
  0xc9   : > { %952 = shalt.err (!%p949_p0)
}
  0xca   : > { %s1023_s8 = smov 128   ;;  %s1024_s10 = smov 8   ;;  %v707_v52 = vmin.f32 %v703_v17, %v704_v23  ;;  %v708_v43 = vmin.f32 %v705_v39, %v706_v53  ;;  %v719_v20 = vsel %vm702_vm3, %v694_v60, -3e+38  ;;  %v720_v38 = vmax.f32 %v716_v6, %v717_v56 }
  0xcb   : > { %876 = dma.vmem_to_hbm [thread:$0]  (%p1084_p5), %s1282_s9, 512, %s1280_s17, %s733_s19, %s1023_s8, %s1023_s8, %s1024_s10   ;;  %v721_v47 = vmax.f32 %v718_v31, %v719_v20  ;;  %vm729_vm4 = vcmask 1040384  }
  0xcc   : > { %v709_v27 = vmin.f32 %v707_v52, %v708_v43  ;;  %s863_s11 = sshll.u32 %s1260_s5, 1  ;;  %s1320_s24 = scalar_lea.hbm %s1366_s3, %s867_s29 }
  0xcd   : > { %v722_v2 = vmax.f32 %v720_v38, %v721_v47  ;;  %s175_s9 = scalar_lea.vmem [#allocation4], %s863_s11  ;;  %s738_s25 = scalar_lea.sflag [#allocation5], %s1260_s5 }
  0xce   : > { %v710_v0 = vrot.slane %v709_v27, 4  ;;  %s767_s17 = sshll.u32 %s175_s9, 4  ;;  %s1025_s27 = smov [#allocation4]   ;;  %s1322_s17 = int_to_ptr.vmem [resolvable:$true] %s767_s17 }
  0xcf   : > { %v723_v57 = vrot.slane %v722_v2, 4  ;;  %s953_s26 = scalar_lea.vmem %s1322_s17, 32  ;;  %s957_s16 = sshll.u32 %s1025_s27, 4  ;;  %s958_s16 = int_to_ptr.vmem [resolvable:$false] %s957_s16 }
  0xd0   : > { %v711_v59 = vmin.f32 %v709_v27, %v710_v0  ;;  %p954_p1 = scmp.ne.s32.totalorder %s1322_s17, %s953_s26  ;;  %s959_s28 = scalar_lea.vmem %s958_s16, 64 }
  0xd1   : > { %v724_v9 = vmax.f32 %v722_v2, %v723_v57  ;;  %p960_p4 = scmp.lt.s32.totalorder %s1322_s17, %s958_s16  ;;  %p961_p7 = scmp.lt.s32.totalorder %s959_s28, %s953_s26 }
  0xd2   : > { %v712_v28 = vrot.slane %v711_v59, 2  ;;  %p955_p2 = pnand %p954_p1, %p1084_p5 }
  0xd3   : > { %v725_v21 = vrot.slane %v724_v9, 2  ;;  %p962_p8 = por %p961_p7, %p960_p4 }
  0xd4   : > { %v713_v22 = vmin.f32 %v711_v59, %v712_v28  ;;  %p956_p3 = pneg %p955_p2 }
  0xd5   : > { %v726_v14 = vmax.f32 %v724_v9, %v725_v21 }
  0xd6   : > { %v714_v40 = vrot.slane %v713_v22, 1  ;;  %p963_p9 = pnand %p962_p8, %p956_p3 }
  0xd7   : > { %v727_v33 = vrot.slane %v726_v14, 1 }
  0xd8   : > { %v715_v15 = vmin.f32 %v713_v22, %v714_v40 }
  0xd9   : > { %v728_v4 = vmax.f32 %v726_v14, %v727_v33 }
  0xdb   : > { %v730_v42 = vsel %vm729_vm4, %v715_v15, %v728_v4 }
  0xdc   : > { %731 = vst [vmem:[%s175_s9] sm:$0x3] %v730_v42 }
  0xdd   : > { %966 = shalt.err (!%p963_p9)
}
  0xde   : > { %s967_s29 = scalar_lea.hbm %s1320_s24, 32  ;;  %s971_s4 = scalar_lea.hbm %s1366_s3, 64 }
  0xdf   : > { %p968_p10 = scmp.ne.s32.totalorder %s1320_s24, %s967_s29  ;;  %p972_p13 = scmp.lt.u32.totalorder %s1320_s24, %s1366_s3 }
  0xe0   : > { %p973_p0 = scmp.lt.u32.totalorder %s971_s4, %s967_s29  ;;  %p975_p2 = scmp.lt.u32.totalorder %s967_s29, %s1320_s24 }
  0xe1   : > { %p969_p11 = pnand %p968_p10, %p1084_p5 }
  0xe2   : > { %p974_p1 = por %p973_p0, %p972_p13 }
  0xe3   : > { %p970_p12 = pneg %p969_p11 }
  0xe4   : > { %p976_p3 = por %p975_p2, %p974_p1 }
  0xe6   : > { %p977_p4 = pnand %p976_p3, %p970_p12 }
  0xe8   : > { %980 = shalt.err (!%p977_p4)
}
  0xe9   : > { %877 = dma.vmem_to_hbm [thread:$0]  (%p1084_p5), %s1322_s17, 32, %s1320_s24, %s738_s25  }
  0xea PF: > { %p887_p7 = scmp.ge.s32.totalorder %s1019_s15, 2  ;;  %s779_s8 = sand.u32 1, %s1007_s12  }
  0xeb   : > { %s780_s10 = scalar_lea.sflag [#allocation3], %s779_s8 }
  0xec   : > { %p881_p8 = pnand %p887_p7, %p1088_p6 }
  0xee   : > { %998 = dma.done.wait (!%p881_p8), %s780_s10, 512  }
  0xef   : > { %1000 = vsyncadd (!%p881_p8), %s780_s10, 4294966784  ;;  %s789_s11 = scalar_lea.sflag [#allocation5], %s779_s8 }
  0xf0   : > { %1002 = dma.done.wait (!%p881_p8), %s789_s11, 32  }
  0xf1   : > { %1004 = vsyncadd (!%p881_p8), %s789_s11, 4294967264  ;;  %p17_p5 = scmp.ge.s32.totalorder %s1071_s18, 4   ;;  %s1388_s12 = smov %s1011_s13 }
  0xf2   : > { %s1389_s13 = smov %s1015_s14  ;;  %s1390_s14 = smov %s1082_s21 }
  0xf3   : > { %s1391_s15 = smov %s1071_s18  ;;  %19 = sbr.rel (!%p17_p5) target bundleno = 5 (0x5), region = 80 }
  0xfa   :  { %794 = vsyncpa [#allocation3], 1 }
  0xfb   :  { %796 = vsyncpa [#allocation3 + $0x1], 1 }
  0xfc   :  { %797 = vsyncpa [#allocation5], 1 }
  0xfd   :  { %799 = vsyncpa [#allocation5 + $0x1], 1 }

</bundles_post_ra>
